<compile_context>
chip_gen: v7x
topology: tpu7x:2x2x1
jax: 0.10.0
libtpu: 0.0.40
codegen_flags: <defaults>
</compile_context>

<pallas_src>
import functools

import jax
import jax.numpy as jnp
from jax.experimental import pallas as pl
from jax.experimental.pallas import tpu as pltpu

# BipedalWalker-v3 dims (synthetic, no gym needed)
STATE_DIM = 24
ACTION_DIM = 4
MAX_ACTION = 1.0
H1, H2 = 400, 300

# lane-dense (multiple-of-128) padded widths used for compute
H1P = 512      # 400 -> 512
H2P = 384      # 300 -> 384
OUTP = 128     # 4   -> 128 (matmul / tanh width)
OUT_STORE = 8  # 4   -> 8   (HBM writeback width; sliced to 4 in the wrapper)

_SPLIT_MIN_B = 256  # only split across TensorCores when each gets >=128 rows


def _cdiv(a, b):
    return (a + b - 1) // b


def _round_up(n, m):
    return ((n + m - 1) // m) * m


def _tensorcores_per_chip():
    """Best-effort detection: v7x has 2 TCs/chip, v5e/v6e have 1."""
    try:
        kind = jax.devices()[0].device_kind.lower()
    except Exception:
        return 1
    return 2 if ("v7" in kind or "7x" in kind) else 1


def _choose_batch_tile(B, tb_max):
    """Balanced batch tiling: minimize padding, amortize per-step overhead."""
    n_steps = _cdiv(B, tb_max)
    cores = _tensorcores_per_chip()
    if cores > 1 and B >= _SPLIT_MIN_B:
        # keep an even number of >=2 steps so both TensorCores get work
        n_steps = _round_up(max(n_steps, cores), cores)
    tb = _round_up(_cdiv(B, n_steps), 16)
    return tb, n_steps * tb


def actor_kernel(x_ref, w1_ref, b1_ref, w2_ref, b2_ref, w3_ref, b3_ref,
                 out_ref, *, max_action):
    # layer 1: (tb, 24) @ (24, 512) + (1, 512) -> relu   (bf16 matmul, f32 acc)
    h = jnp.dot(x_ref[...].astype(jnp.bfloat16), w1_ref[...],
                preferred_element_type=jnp.float32)
    h = jnp.maximum(h + b1_ref[...], 0.0).astype(jnp.bfloat16)
    # layer 2: (tb, 512) @ (512, 384) + (1, 384) -> relu
    h = jnp.dot(h, w2_ref[...], preferred_element_type=jnp.float32)
    h = jnp.maximum(h + b2_ref[...], 0.0).astype(jnp.bfloat16)
    # layer 3: (tb, 384) @ (384, 128) + (1, 128) -> tanh [* max_action]
    h = jnp.dot(h, w3_ref[...], preferred_element_type=jnp.float32)
    h = jnp.tanh(h + b3_ref[...])
    if max_action != 1.0:            # static Python branch: skipped when 1.0
        h = h * max_action
    # store only the first OUT_STORE lanes -> 16x less HBM writeback
    out_ref[...] = h[:, :OUT_STORE]


def pad_params(params):
    """Zero-pad (in, out) weights/biases to lane-dense widths; weights -> bf16.

    Padding is applied consistently (extra output cols of layer i AND the
    matching extra input rows of layer i+1 are zero), so the math is unchanged.
    """
    w1, b1, w2, b2, w3, b3 = params
    w1p = jnp.zeros((STATE_DIM, H1P), jnp.float32).at[:, :H1].set(w1)
    b1p = jnp.zeros((1, H1P), jnp.float32).at[:, :H1].set(b1)
    w2p = jnp.zeros((H1P, H2P), jnp.float32).at[:H1, :H2].set(w2)
    b2p = jnp.zeros((1, H2P), jnp.float32).at[:, :H2].set(b2)
    w3p = jnp.zeros((H2P, OUTP), jnp.float32).at[:H2, :ACTION_DIM].set(w3)
    b3p = jnp.zeros((1, OUTP), jnp.float32).at[:, :ACTION_DIM].set(b3)
    return (w1p.astype(jnp.bfloat16), b1p,
            w2p.astype(jnp.bfloat16), b2p,
            w3p.astype(jnp.bfloat16), b3p)


def actor_forward(x, padded_params, *, max_action=MAX_ACTION, tb_max=1024):
    """x: (B, STATE_DIM) float32 -> (B, ACTION_DIM) float32."""
    w1, b1, w2, b2, w3, b3 = padded_params
    x = x.astype(jnp.float32)
    B = x.shape[0]

    tb, Bp = _choose_batch_tile(B, tb_max)
    if Bp != B:
        x = jnp.pad(x, ((0, Bp - B), (0, 0)))

    grid = (Bp // tb,)
    rep = lambda i: (0, 0)  # weights/biases: same block every grid step

    out = pl.pallas_call(
        functools.partial(actor_kernel, max_action=max_action),
        out_shape=jax.ShapeDtypeStruct((Bp, OUT_STORE), jnp.float32),
        grid_spec=pltpu.PrefetchScalarGridSpec(
            num_scalar_prefetch=0,
            grid=grid,
            in_specs=[
                pl.BlockSpec((tb, STATE_DIM), lambda i: (i, 0)),   # x tile (f32)
                pl.BlockSpec((STATE_DIM, H1P), rep),               # W1 (bf16)
                pl.BlockSpec((1, H1P), rep),                       # b1 (f32)
                pl.BlockSpec((H1P, H2P), rep),                     # W2 (bf16)
                pl.BlockSpec((1, H2P), rep),                       # b2 (f32)
                pl.BlockSpec((H2P, OUTP), rep),                    # W3 (bf16)
                pl.BlockSpec((1, OUTP), rep),                      # b3 (f32)
            ],
            out_specs=pl.BlockSpec((tb, OUT_STORE), lambda i: (i, 0)),
        ),
        compiler_params=pltpu.CompilerParams(
            dimension_semantics=("parallel",)),
    )(x, w1, b1, w2, b2, w3, b3)

    # slice off padded batch rows and the 4 padded action lanes
    return out[:B, :ACTION_DIM]


def init_params(key):
    """Deterministic init mimicking nn.Linear's U(-1/sqrt(fan_in), 1/sqrt(fan_in))."""
    ks = jax.random.split(key, 6)

    def linear(kw, kb, fan_in, fan_out):
        bound = 1.0 / jnp.sqrt(fan_in)
        # stored as (in, out) so the kernel does x @ W
        w = jax.random.uniform(kw, (fan_in, fan_out), jnp.float32, -bound, bound)
        b = jax.random.uniform(kb, (1, fan_out), jnp.float32, -bound, bound)
        return w, b

    w1, b1 = linear(ks[0], ks[1], STATE_DIM, H1)
    w2, b2 = linear(ks[2], ks[3], H1, H2)
    w3, b3 = linear(ks[4], ks[5], H2, ACTION_DIM)
    return (w1, b1, w2, b2, w3, b3)


def actor_ref(x, params, max_action=MAX_ACTION):
    """Pure-JAX f32 reference of the PyTorch forward."""
    w1, b1, w2, b2, w3, b3 = params
    h = jnp.maximum(x @ w1 + b1, 0.0)
    h = jnp.maximum(h @ w2 + b2, 0.0)
    return jnp.tanh(h @ w3 + b3) * max_action


# TODO(synk): gym env construction / Actor.act()'s host tensor plumbing are
# host-side concerns, not kernel ops; only forward() is implemented here.

if __name__ == "__main__":
    key = jax.random.PRNGKey(0)
    kp, kx1, kx2, kx3 = jax.random.split(key, 4)

    params = init_params(kp)
    padded = pad_params(params)

    # primary check (batch=2, state_dim=24) -> single small grid step
    batch = 2
    x = jax.random.normal(kx1, (batch, STATE_DIM), jnp.float32)
    out = jax.block_until_ready(actor_forward(x, padded))
    ref = actor_ref(x, params)
    assert out.shape == (batch, ACTION_DIM)
    assert jnp.allclose(out, ref, atol=3e-2, rtol=3e-2), "mismatch vs reference"

    # non-aligned batch (exercises batch padding + balanced tile selection)
    x2 = jax.random.normal(kx2, (33, STATE_DIM), jnp.float32)
    out2 = jax.block_until_ready(actor_forward(x2, padded))
    ref2 = actor_ref(x2, params)
    assert out2.shape == (33, ACTION_DIM)
    assert jnp.allclose(out2, ref2, atol=3e-2, rtol=3e-2), "mismatch (batch=33)"

    # forced multi-step grid (small tb_max) -> exercises pipelining across
    # batch tiles with weight blocks held resident (constant index_map)
    x3 = jax.random.normal(kx3, (96, STATE_DIM), jnp.float32)
    out3 = jax.block_until_ready(actor_forward(x3, padded, tb_max=32))
    ref3 = actor_ref(x3, params)
    assert out3.shape == (96, ACTION_DIM)
    assert jnp.allclose(out3, ref3, atol=3e-2, rtol=3e-2), "mismatch (batch=96)"

    print("KERNEL_OK")
</pallas_src>

<mosaic_0001>
module attributes {stable_mosaic.version = 11 : i64} {
  func.func @actor_kernel(%arg0: i32, %arg1: memref<16x24xf32, #tpu.memory_space<vmem>>, %arg2: memref<24x512xbf16, #tpu.memory_space<vmem>>, %arg3: memref<1x512xf32, #tpu.memory_space<vmem>>, %arg4: memref<512x384xbf16, #tpu.memory_space<vmem>>, %arg5: memref<1x384xf32, #tpu.memory_space<vmem>>, %arg6: memref<384x128xbf16, #tpu.memory_space<vmem>>, %arg7: memref<1x128xf32, #tpu.memory_space<vmem>>, %arg8: memref<16x8xf32, #tpu.memory_space<vmem>>) attributes {dimension_semantics = [#tpu.dimension_semantics<parallel>], iteration_bounds = array<i64: 1>, scalar_prefetch = 0 : i64, scratch_operands = 0 : i64, tpu.core_type = #tpu.core_type<tc>, window_params = [{transform_indices = @transform_0, window_bounds = array<i64: 16, 24>}, {pipeline_mode = #tpu.pipeline_mode<synchronous>, transform_indices = @transform_1, window_bounds = array<i64: 24, 512>}, {pipeline_mode = #tpu.pipeline_mode<synchronous>, transform_indices = @transform_2, window_bounds = array<i64: 1, 512>}, {pipeline_mode = #tpu.pipeline_mode<synchronous>, transform_indices = @transform_3, window_bounds = array<i64: 512, 384>}, {pipeline_mode = #tpu.pipeline_mode<synchronous>, transform_indices = @transform_4, window_bounds = array<i64: 1, 384>}, {pipeline_mode = #tpu.pipeline_mode<synchronous>, transform_indices = @transform_5, window_bounds = array<i64: 384, 128>}, {pipeline_mode = #tpu.pipeline_mode<synchronous>, transform_indices = @transform_6, window_bounds = array<i64: 1, 128>}, {transform_indices = @transform_7, window_bounds = array<i64: 16, 8>}]} {
    %c0 = arith.constant 0 : index
    %c0_0 = arith.constant 0 : index
    %0 = vector.load %arg1[%c0, %c0_0] : memref<16x24xf32, #tpu.memory_space<vmem>>, vector<16x24xf32>
    %1 = arith.truncf %0 : vector<16x24xf32> to vector<16x24xbf16>
    %c0_1 = arith.constant 0 : index
    %c0_2 = arith.constant 0 : index
    %2 = vector.load %arg2[%c0_1, %c0_2] : memref<24x512xbf16, #tpu.memory_space<vmem>>, vector<24x512xbf16>
    %cst = arith.constant dense<0.000000e+00> : vector<16x512xf32>
    %3 = tpu.matmul %1, %2, %cst {dimension_numbers = #tpu.dot_dimension_numbers<[1], [0], [0], [1], [0, 0, 1, 1], [], []>} : vector<16x24xbf16>, vector<24x512xbf16>, vector<16x512xf32> -> vector<16x512xf32>
    %c0_3 = arith.constant 0 : index
    %c0_4 = arith.constant 0 : index
    %4 = vector.load %arg3[%c0_3, %c0_4] : memref<1x512xf32, #tpu.memory_space<vmem>>, vector<1x512xf32>
    %5 = vector.broadcast %4 : vector<1x512xf32> to vector<16x512xf32>
    %6 = arith.addf %3, %5 : vector<16x512xf32>
    %cst_5 = arith.constant 0.000000e+00 : f32
    %7 = vector.broadcast %cst_5 : f32 to vector<16x512xf32>
    %8 = arith.maximumf %6, %7 : vector<16x512xf32>
    %9 = arith.truncf %8 : vector<16x512xf32> to vector<16x512xbf16>
    %c0_6 = arith.constant 0 : index
    %c0_7 = arith.constant 0 : index
    %10 = vector.load %arg4[%c0_6, %c0_7] : memref<512x384xbf16, #tpu.memory_space<vmem>>, vector<512x384xbf16>
    %cst_8 = arith.constant dense<0.000000e+00> : vector<16x384xf32>
    %11 = tpu.matmul %9, %10, %cst_8 {dimension_numbers = #tpu.dot_dimension_numbers<[1], [0], [0], [1], [0, 0, 1, 1], [], []>} : vector<16x512xbf16>, vector<512x384xbf16>, vector<16x384xf32> -> vector<16x384xf32>
    %c0_9 = arith.constant 0 : index
    %c0_10 = arith.constant 0 : index
    %12 = vector.load %arg5[%c0_9, %c0_10] : memref<1x384xf32, #tpu.memory_space<vmem>>, vector<1x384xf32>
    %13 = vector.broadcast %12 : vector<1x384xf32> to vector<16x384xf32>
    %14 = arith.addf %11, %13 : vector<16x384xf32>
    %cst_11 = arith.constant 0.000000e+00 : f32
    %15 = vector.broadcast %cst_11 : f32 to vector<16x384xf32>
    %16 = arith.maximumf %14, %15 : vector<16x384xf32>
    %17 = arith.truncf %16 : vector<16x384xf32> to vector<16x384xbf16>
    %c0_12 = arith.constant 0 : index
    %c0_13 = arith.constant 0 : index
    %18 = vector.load %arg6[%c0_12, %c0_13] : memref<384x128xbf16, #tpu.memory_space<vmem>>, vector<384x128xbf16>
    %cst_14 = arith.constant dense<0.000000e+00> : vector<16x128xf32>
    %19 = tpu.matmul %17, %18, %cst_14 {dimension_numbers = #tpu.dot_dimension_numbers<[1], [0], [0], [1], [0, 0, 1, 1], [], []>} : vector<16x384xbf16>, vector<384x128xbf16>, vector<16x128xf32> -> vector<16x128xf32>
    %c0_15 = arith.constant 0 : index
    %c0_16 = arith.constant 0 : index
    %20 = vector.load %arg7[%c0_15, %c0_16] : memref<1x128xf32, #tpu.memory_space<vmem>>, vector<1x128xf32>
    %21 = vector.broadcast %20 : vector<1x128xf32> to vector<16x128xf32>
    %22 = arith.addf %19, %21 : vector<16x128xf32>
    %23 = math.tanh %22 : vector<16x128xf32>
    %24 = vector.extract_strided_slice %23 {offsets = [0, 0], sizes = [16, 8], strides = [1, 1]} : vector<16x128xf32> to vector<16x8xf32>
    %c0_17 = arith.constant 0 : index
    %c0_18 = arith.constant 0 : index
    %25 = vector.load %arg8[%c0_17, %c0_18] : memref<16x8xf32, #tpu.memory_space<vmem>>, vector<16x8xf32>
    tpu.vector_store %arg8[%c0_17, %c0_18], %24 {strides = array<i32>} : memref<16x8xf32, #tpu.memory_space<vmem>>, vector<16x8xf32>,
    return
  }
  func.func @transform_0(%arg0: i32) -> (i32, i32) {
    %c0_i32 = arith.constant 0 : i32
    %c0_i32_0 = arith.constant 0 : i32
    return %arg0, %c0_i32 : i32, i32
  }
  func.func @transform_1(%arg0: i32) -> (i32, i32) {
    %c0_i32 = arith.constant 0 : i32
    %c0_i32_0 = arith.constant 0 : i32
    %c0_i32_1 = arith.constant 0 : i32
    return %c0_i32, %c0_i32_0 : i32, i32
  }
  func.func @transform_2(%arg0: i32) -> (i32, i32) {
    %c0_i32 = arith.constant 0 : i32
    %c0_i32_0 = arith.constant 0 : i32
    %c0_i32_1 = arith.constant 0 : i32
    return %c0_i32, %c0_i32_0 : i32, i32
  }
  func.func @transform_3(%arg0: i32) -> (i32, i32) {
    %c0_i32 = arith.constant 0 : i32
    %c0_i32_0 = arith.constant 0 : i32
    %c0_i32_1 = arith.constant 0 : i32
    return %c0_i32, %c0_i32_0 : i32, i32
  }
  func.func @transform_4(%arg0: i32) -> (i32, i32) {
    %c0_i32 = arith.constant 0 : i32
    %c0_i32_0 = arith.constant 0 : i32
    %c0_i32_1 = arith.constant 0 : i32
    return %c0_i32, %c0_i32_0 : i32, i32
  }
  func.func @transform_5(%arg0: i32) -> (i32, i32) {
    %c0_i32 = arith.constant 0 : i32
    %c0_i32_0 = arith.constant 0 : i32
    %c0_i32_1 = arith.constant 0 : i32
    return %c0_i32, %c0_i32_0 : i32, i32
  }
  func.func @transform_6(%arg0: i32) -> (i32, i32) {
    %c0_i32 = arith.constant 0 : i32
    %c0_i32_0 = arith.constant 0 : i32
    %c0_i32_1 = arith.constant 0 : i32
    return %c0_i32, %c0_i32_0 : i32, i32
  }
  func.func @transform_7(%arg0: i32) -> (i32, i32) {
    %c0_i32 = arith.constant 0 : i32
    %c0_i32_0 = arith.constant 0 : i32
    return %arg0, %c0_i32 : i32, i32
  }
}

</mosaic_0001>

<bundles_post_ra>
// kernel: tpu_custom_call.1
= control target key start
LH: loop header
LB: loop body
LE: loop exit
PB: predicated region body
PF: predicated region fallthrough
CT: control target
= control target key end

     0   :  { %12 = vsyncpa [#allocation3], 0  ;;  %s2049_s0 = inlined_call_operand.hbm [shape: f32[16,24], index: 0, kind: input, shape index: {}]   ;;  %s2050_s1 = inlined_call_operand.hbm [shape: bf16[24,512], index: 1, kind: input, shape index: {}]   ;;  %s2051_s2 = inlined_call_operand.vmem [shape: f32[1,512], index: 2, kind: input, shape index: {}]   ;;  %s2052_s3 = inlined_call_operand.hbm [shape: bf16[512,384], index: 3, kind: input, shape index: {}]   ;;  %s2053_s4 = inlined_call_operand.vmem [shape: f32[1,384], index: 4, kind: input, shape index: {}]   ;;  %s2054_s5 = inlined_call_operand.hbm [shape: bf16[384,128], index: 5, kind: input, shape index: {}]   ;;  %s2055_s6 = inlined_call_operand.vmem [shape: f32[1,128], index: 6, kind: input, shape index: {}]   ;;  %s2056_s7 = inlined_call_operand.vmem [shape: f32[16,8], index: 7, kind: output, shape index: {}]  }
   0x1   :  { %13 = vsyncpa [#allocation5], 0 }
   0x2   :  { %14 = vsyncpa [#allocation8], 0  ;;  %s1896_s24 = smov [#allocation4]   ;;  %s1802_s28 = scalar_lea.hbm %s2050_s1, 768 }
   0x3   :  { %s32_s25 = sshll.u32 %s1896_s24, 4  ;;  %p1803_p0 = scmp.ne.s32.totalorder %s2050_s1, %s1802_s28  ;;  %s33_s25 = int_to_ptr.vmem [resolvable:$true] %s32_s25 }
   0x4   :  { %p1806_p1 = scmp.lt.u32.totalorder %s1802_s28, %s2050_s1 }
   0x6   :  { %p1808_p2 = pnand %p1806_p1, %p1803_p0 }
   0x8   :  { %1811 = shalt.err (!%p1808_p2)
}
   0x9   :  { %s1812_s10 = scalar_lea.vmem %s33_s25, 768  ;;  %p1817_p4 = scmp.lt.s32.totalorder %s33_s25, %s33_s25 }
   0xa   :  { %p1813_p3 = scmp.ne.s32.totalorder %s33_s25, %s1812_s10  ;;  %p1818_p5 = scmp.lt.s32.totalorder %s1812_s10, %s1812_s10 }
   0xc   :  { %p1819_p6 = por %p1818_p5, %p1817_p4 }
   0xe   :  { %p1820_p7 = pnand %p1819_p6, %p1813_p3 }
  0x10   :  { %1823 = shalt.err (!%p1820_p7)
}
  0x11   :  { %s1897_s11 = smov 256   ;;  %s1898_s12 = smov 16  }
  0x12   :  { %38 = dma.hbm_to_vmem [thread:$0]  %s2050_s1, 768, %s33_s25, [#allocation5], %s1897_s11, %s1897_s11, %s1898_s12  }
  0x13   :  { %s1899_s15 = smov [#allocation2]   ;;  %s1824_s19 = scalar_lea.hbm %s2049_s0, 256 }
  0x14   :  { %s20_s16 = sshll.u32 %s1899_s15, 4  ;;  %p1825_p8 = scmp.ne.s32.totalorder %s2049_s0, %s1824_s19  ;;  %s21_s16 = int_to_ptr.vmem [resolvable:$true] %s20_s16 }
  0x15   :  { %p1828_p9 = scmp.lt.u32.totalorder %s1824_s19, %s2049_s0 }
  0x17   :  { %p1830_p10 = pnand %p1828_p9, %p1825_p8 }
  0x19   :  { %1833 = shalt.err (!%p1830_p10)
}
  0x1a   :  { %s1834_s24 = scalar_lea.vmem %s21_s16, 256  ;;  %p1839_p12 = scmp.lt.s32.totalorder %s21_s16, %s21_s16 }
  0x1b   :  { %p1835_p11 = scmp.ne.s32.totalorder %s21_s16, %s1834_s24  ;;  %p1840_p13 = scmp.lt.s32.totalorder %s1834_s24, %s1834_s24 }
  0x1d   :  { %p1841_p0 = por %p1840_p13, %p1839_p12 }
  0x1f   :  { %p1842_p1 = pnand %p1841_p0, %p1835_p11 }
  0x21   :  { %1845 = shalt.err (!%p1842_p1)
}
  0x22   :  { %s1900_s1 = smov 128   ;;  %s1901_s25 = smov 8  }
  0x23   :  { %26 = dma.hbm_to_vmem [thread:$0]  %s2049_s0, 256, %s21_s16, [#allocation3], %s1900_s1, %s1900_s1, %s1901_s25  }
  0x24   :  { %s1902_s28 = smov [#allocation6]   ;;  %s1846_s9 = scalar_lea.hbm %s2052_s3, 12288 }
  0x25   :  { %s46_s29 = sshll.u32 %s1902_s28, 4  ;;  %p1847_p2 = scmp.ne.s32.totalorder %s2052_s3, %s1846_s9  ;;  %s47_s29 = int_to_ptr.vmem [resolvable:$true] %s46_s29 }
  0x26   :  { %p1850_p3 = scmp.lt.u32.totalorder %s1846_s9, %s2052_s3 }
  0x28   :  { %p1852_p4 = pnand %p1850_p3, %p1847_p2 }
  0x2a   :  { %1855 = shalt.err (!%p1852_p4)
}
  0x2b   :  { %s1856_s14 = scalar_lea.vmem %s47_s29, 12288  ;;  %p1861_p6 = scmp.lt.s32.totalorder %s47_s29, %s47_s29 }
  0x2c   :  { %p1857_p5 = scmp.ne.s32.totalorder %s47_s29, %s1856_s14  ;;  %p1862_p7 = scmp.lt.s32.totalorder %s1856_s14, %s1856_s14 }
  0x2e   :  { %p1863_p8 = por %p1862_p7, %p1861_p6 }
  0x30   :  { %p1864_p9 = pnand %p1863_p8, %p1857_p5 }
  0x32   :  { %1867 = shalt.err (!%p1864_p9)
}
  0x33   :  { %s1903_s0 = smov 192   ;;  %s1904_s15 = smov 12  }
  0x34   :  { %52 = dma.hbm_to_vmem [thread:$0]  %s2052_s3, 12288, %s47_s29, [#allocation5], %s1903_s0, %s1903_s0, %s1904_s15  }
  0x35   :  { %s1905_s18 = smov [#allocation7]   ;;  %s1868_s22 = scalar_lea.hbm %s2054_s5, 3072 }
  0x36   :  { %s60_s19 = sshll.u32 %s1905_s18, 4  ;;  %p1869_p10 = scmp.ne.s32.totalorder %s2054_s5, %s1868_s22  ;;  %s61_s19 = int_to_ptr.vmem [resolvable:$true] %s60_s19 }
  0x37   :  { %p1872_p11 = scmp.lt.u32.totalorder %s1868_s22, %s2054_s5 }
  0x39   :  { %p1874_p12 = pnand %p1872_p11, %p1869_p10 }
  0x3b   :  { %1877 = shalt.err (!%p1874_p12)
}
  0x3c   :  { %s1878_s26 = scalar_lea.vmem %s61_s19, 3072  ;;  %p1883_p0 = scmp.lt.s32.totalorder %s61_s19, %s61_s19 }
  0x3d   :  { %p1879_p13 = scmp.ne.s32.totalorder %s61_s19, %s1878_s26  ;;  %p1884_p1 = scmp.lt.s32.totalorder %s1878_s26, %s1878_s26 }
  0x3f   :  { %p1885_p2 = por %p1884_p1, %p1883_p0 }
  0x41   :  { %p1886_p3 = pnand %p1885_p2, %p1879_p13 }
  0x43   :  { %1889 = shalt.err (!%p1886_p3)
}
  0x44   :  { %s1906_s3 = smov 64   ;;  %s1907_s27 = smov 4  }
  0x45   :  { %66 = dma.hbm_to_vmem [thread:$0]  %s2054_s5, 3072, %s61_s19, [#allocation8], %s1906_s3, %s1906_s3, %s1907_s27  }
  0x46   :  { %1890 = dma.done.wait [#allocation3], 256  }
  0x47   :  { %1891 = vsyncadd [#allocation3], 4294967040 }
  0x48   :  { %1892 = dma.done.wait [#allocation5], 13056  }
  0x49   :  { %1893 = vsyncadd [#allocation5], 4294954240 }
  0x4a   :  { %1894 = dma.done.wait [#allocation8], 3072  }
  0x4b   :  { %1895 = vsyncadd [#allocation8], 4294964224  ;;  %v1908_v0 = vmov 0   ;;  %v1636_v1 = vld [vmem:[#allocation4 + $0x4] ss:$16 sps:$4 sm:$0xff]   ;;  %vm147_vm0 = vcmask 1043456  }
  0x4c   :  { %192 = vmatprep.mubr.bf16.mxu0 %v1908_v0  ;;  %235 = vmatprep.mubr.bf16.mxu1 %v1908_v0  ;;  %v1638_v2 = vld [vmem:[#allocation4] ss:$16 sps:$4 sm:$0xff]   ;;  %v83_v7 = vld [vmem:[#allocation2 + $0x8] sm:$0xff]  ;;  %v90_v10 = vld [vmem:[#allocation4 + $0x28] sm:$0xff]  ;;  %vm143_vm1 = vcmask 195584   ;;  %vm1910_vm2 = vmmov 0  }
  0x4d   :  { %v89_v3 = vld [vmem:[#allocation4 + $0x20] sm:$0xff]  ;;  %v82_v4 = vld [vmem:[#allocation2] sm:$0xff]  ;;  %160 = vmatprep.subr.bf16.mxu0 %v1636_v1  ;;  %v1641_v8 = vld [vmem:[#allocation4 + $0xc] ss:$16 sps:$4 sm:$0xff]   ;;  %v1392_v12 = vcombine.high %v90_v10, %v90_v10  ;;  %v1391_v13 = vcombine.low %v90_v10, %v90_v10  ;;  %vm1375_vm3 = vcmask 64512  }
  0x4e   :  { %v1390_v5 = vcombine.high %v89_v3, %v89_v3  ;;  %v1389_v6 = vcombine.low %v89_v3, %v89_v3  ;;  %161 = vmatpush1.bf16.msra.mxu0 %v1638_v2  ;;  %v1643_v9 = vld [vmem:[#allocation4 + $0x8] ss:$16 sps:$4 sm:$0xff]   ;;  %203 = vmatprep.subr.bf16.mxu1 %v1641_v8  ;;  %v1648_v14 = vld [vmem:[#allocation6 + $0x4] ss:$12 sps:$4 sm:$0xff]   ;;  %v84_v15 = vpack.c.bf16 %v83_v7, %v82_v4  ;;  %v1646_v17 = vld [vmem:[#allocation6] ss:$12 sps:$4 sm:$0xff]   ;;  %v93_v2 = vlaneseq }
  0x4f   :  { %204 = vmatpush1.bf16.msra.mxu1 %v1643_v9  ;;  %v155_v16 = vsel %vm147_vm0, %v1391_v13, 0  ;;  %v1651_v18 = vld [vmem:[#allocation6 + $0x1c] ss:$12 sps:$4 sm:$0xff]   ;;  %v1649_v19 = vld [vmem:[#allocation6 + $0x18] ss:$12 sps:$4 sm:$0xff]  }
  0x50   :  { %1393 = vmatprep.subr.msk.bf16.mxu0 %vm147_vm0, %v1390_v5  ;;  %v149_v11 = vsel %vm147_vm0, %v1389_v6, 0  ;;  %1395 = vmatprep.subr.msk.bf16.mxu1 %vm147_vm0, %v1392_v12  ;;  %v1654_v20 = vld [vmem:[#allocation6 + $0x34] ss:$12 sps:$4 sm:$0xff]   ;;  %v1652_v21 = vld [vmem:[#allocation6 + $0x30] ss:$12 sps:$4 sm:$0xff]   ;;  %v2003_v3 = vshrl.u32 %v93_v2, 7 }
  0x51   :  { %v1657_v22 = vld [vmem:[#allocation6 + $0x4c] ss:$12 sps:$4 sm:$0xff]   ;;  %v1673_v23 = vld [vmem:[#allocation6 + $0xc8] ss:$12 sps:$4 sm:$0xff]   ;;  %v1660_v26 = vld [vmem:[#allocation6 + $0x64] ss:$12 sps:$4 sm:$0xff]  }
  0x52   :  { %163 = vmatpush1.bf16.msra.mxu0 %v149_v11  ;;  %v1674_v24 = vld [vmem:[#allocation6 + $0x8] ss:$12 sps:$4 sm:$0xff]   ;;  %v1678_v27 = vld [vmem:[#allocation6 + $0xe0] ss:$12 sps:$4 sm:$0xff]   ;;  %v1683_v31 = vld [vmem:[#allocation6 + $0xf8] ss:$12 sps:$4 sm:$0xff]  }
  0x53   :  { %915 = vmatprep.subr.bf16.mxu0 %v1648_v14  ;;  %206 = vmatpush1.bf16.msra.mxu1 %v155_v16  ;;  %v1655_v25 = vld [vmem:[#allocation6 + $0x48] ss:$12 sps:$4 sm:$0xff]   ;;  %v1679_v28 = vld [vmem:[#allocation6 + $0x20] ss:$12 sps:$4 sm:$0xff]   ;;  %v1684_v32 = vld [vmem:[#allocation6 + $0x38] ss:$12 sps:$4 sm:$0xff]  }
  0x54   :  { %1518 = vmatprep.subr.bf16.mxu1 %v1673_v23  ;;  %v1658_v29 = vld [vmem:[#allocation6 + $0x60] ss:$12 sps:$4 sm:$0xff]   ;;  %v1663_v30 = vld [vmem:[#allocation6 + $0x7c] ss:$12 sps:$4 sm:$0xff]   ;;  %v1661_v33 = vld [vmem:[#allocation6 + $0x78] ss:$12 sps:$4 sm:$0xff]  }
  0x55   :  { %1394 = vmatmul.mubr.msk.bf16.vlgmr.msra.gmra.mrb[0].mxu0 %vm143_vm1, %v84_v15  ;;  %v1688_v34 = vld [vmem:[#allocation6 + $0x110] ss:$12 sps:$4 sm:$0xff]   ;;  %v1666_v36 = vld [vmem:[#allocation6 + $0x94] ss:$12 sps:$4 sm:$0xff]   ;;  %v1669_v40 = vld [vmem:[#allocation6 + $0xac] ss:$12 sps:$4 sm:$0xff]  }
  0x56   :  { %916 = vmatpush1.bf16.msra.mxu0 %v1646_v17  ;;  %1396 = vmatmul.mubr.msk.bf16.vlgmr.msra.gmra.mrb[0].mxu1 %vm143_vm1, %v84_v15  ;;  %v1689_v35 = vld [vmem:[#allocation6 + $0x50] ss:$12 sps:$4 sm:$0xff]   ;;  %v1693_v38 = vld [vmem:[#allocation6 + $0x128] ss:$12 sps:$4 sm:$0xff]   ;;  %v1698_v42 = vld [vmem:[#allocation6 + $0x140] ss:$12 sps:$4 sm:$0xff]  }
  0x57   :  { %917 = vmatprep.subr.bf16.mxu0 %v1651_v18  ;;  %1519 = vmatpush3.bf16.msra.mxu1 %v1674_v24  ;;  %v1664_v37 = vld [vmem:[#allocation6 + $0x90] ss:$12 sps:$4 sm:$0xff]   ;;  %v1694_v39 = vld [vmem:[#allocation6 + $0x68] ss:$12 sps:$4 sm:$0xff]   ;;  %v1699_v44 = vld [vmem:[#allocation6 + $0x80] ss:$12 sps:$4 sm:$0xff]  }
  0x58   :  { %1520 = vmatprep.subr.bf16.mxu1 %v1678_v27  ;;  %v1667_v41 = vld [vmem:[#allocation6 + $0xa8] ss:$12 sps:$4 sm:$0xff]   ;;  %v1672_v43 = vld [vmem:[#allocation6 + $0xc4] ss:$12 sps:$4 sm:$0xff]   ;;  %v1670_v45 = vld [vmem:[#allocation6 + $0xc0] ss:$12 sps:$4 sm:$0xff]  }
  0x59   :  { %v1677_v46 = vld [vmem:[#allocation6 + $0xdc] ss:$12 sps:$4 sm:$0xff]   ;;  %v1675_v47 = vld [vmem:[#allocation6 + $0xd8] ss:$12 sps:$4 sm:$0xff]   ;;  %v1682_v48 = vld [vmem:[#allocation6 + $0xf4] ss:$12 sps:$4 sm:$0xff]  }
  0x5a   :  { %918 = vmatpush1.bf16.msra.mxu0 %v1649_v19  ;;  %v1680_v49 = vld [vmem:[#allocation6 + $0xf0] ss:$12 sps:$4 sm:$0xff]   ;;  %v1687_v50 = vld [vmem:[#allocation6 + $0x10c] ss:$12 sps:$4 sm:$0xff]   ;;  %v1685_v51 = vld [vmem:[#allocation6 + $0x108] ss:$12 sps:$4 sm:$0xff]  }
  0x5b   :  { %919 = vmatprep.subr.bf16.mxu0 %v1654_v20  ;;  %1521 = vmatpush3.bf16.msra.mxu1 %v1679_v28  ;;  %v1692_v52 = vld [vmem:[#allocation6 + $0x124] ss:$12 sps:$4 sm:$0xff]   ;;  %v1690_v53 = vld [vmem:[#allocation6 + $0x120] ss:$12 sps:$4 sm:$0xff]   ;;  %v1697_v54 = vld [vmem:[#allocation6 + $0x13c] ss:$12 sps:$4 sm:$0xff]  }
  0x5c   :  { %1522 = vmatprep.subr.bf16.mxu1 %v1683_v31  ;;  %v1695_v55 = vld [vmem:[#allocation6 + $0x138] ss:$12 sps:$4 sm:$0xff]   ;;  %v1702_v56 = vld [vmem:[#allocation6 + $0x154] ss:$12 sps:$4 sm:$0xff]   ;;  %v1700_v58 = vld [vmem:[#allocation6 + $0x150] ss:$12 sps:$4 sm:$0xff]  }
  0x5d   :  { %v1703_v57 = vld [vmem:[#allocation6 + $0x158] ss:$12 sps:$4 sm:$0xff]   ;;  %v1708_v61 = vld [vmem:[#allocation6 + $0x170] ss:$12 sps:$4 sm:$0xff]   ;;  %v1705_v62 = vld [vmem:[#allocation6 + $0x168] ss:$12 sps:$4 sm:$0xff]  }
  0x5e   :  { %920 = vmatpush1.bf16.msra.mxu0 %v1652_v21  ;;  %v1704_v59 = vld [vmem:[#allocation6 + $0x98] ss:$12 sps:$4 sm:$0xff]   ;;  %v1709_v63 = vld [vmem:[#allocation6 + $0xb0] ss:$12 sps:$4 sm:$0xff]   ;;  %v1713_v1 = vld [vmem:[#allocation6 + $0x248] ss:$12 sps:$4 sm:$0xff]  }
  0x5f   :  { %921 = vmatprep.subr.bf16.mxu0 %v1657_v22  ;;  %1523 = vmatpush3.bf16.msra.mxu1 %v1684_v32  ;;  %v1707_v60 = vld [vmem:[#allocation6 + $0x16c] ss:$12 sps:$4 sm:$0xff]   ;;  %v1712_v0 = vld [vmem:[#allocation6 + $0x184] ss:$12 sps:$4 sm:$0xff]   ;;  %v95_v4 = vsub.s32 0, %v2003_v3  ;;  %v99_v6 = vsub.s32 1, %v2003_v3 }
  0x60   :  { %1524 = vmatprep.subr.bf16.mxu1 %v1688_v34  ;;  %v91_v5 = vld [vmem:[%s2051_s2] sm:$0xf]  ;;  %v103_v7 = vsub.s32 2, %v2003_v3  ;;  %v107_v9 = vsub.s32 3, %v2003_v3  ;;  %v1744_v2 = vld [vmem:[#allocation6 + $0x218] ss:$12 sps:$4 sm:$0xff]  }
  0x61   :  { %v96_v8 = vrot.slane %v91_v5, %v95_v4  ;;  %v100_v10 = vrot.slane %v91_v5, %v99_v6  ;;  %v1791_v3 = vld [vmem:[#allocation7 + $0x88] sm:$0xff]  }
  0x62   :  { %922 = vmatpush1.bf16.msra.mxu0 %v1655_v25  ;;  %v104_v12 = vrot.slane %v91_v5, %v103_v7  ;;  %v108_v15 = vrot.slane %v91_v5, %v107_v9  ;;  %v1747_v5 = vld [vmem:[#allocation6 + $0x22c] ss:$12 sps:$4 sm:$0xff]   ;;  %v1745_v9 = vld [vmem:[#allocation6 + $0x228] ss:$12 sps:$4 sm:$0xff]  }
  0x63   :  { %923 = vmatprep.subr.bf16.mxu0 %v1660_v26  ;;  %1525 = vmatpush3.bf16.msra.mxu1 %v1689_v35 }
  0x64   :  { %1526 = vmatprep.subr.bf16.mxu1 %v1693_v38  ;;  %v1714_v38 = vld [vmem:[#allocation6 + $0x188] ss:$12 sps:$4 sm:$0xff]  }
  0x66   :  { %924 = vmatpush1.bf16.msra.mxu0 %v1658_v29 }
  0x67   :  { %925 = vmatprep.subr.bf16.mxu0 %v1663_v30  ;;  %1527 = vmatpush3.bf16.msra.mxu1 %v1694_v39 }
  0x68   :  { %1528 = vmatprep.subr.bf16.mxu1 %v1698_v42 }
  0x6a   :  { %926 = vmatpush1.bf16.msra.mxu0 %v1661_v33 }
  0x6b   :  { %927 = vmatprep.subr.bf16.mxu0 %v1666_v36  ;;  %1529 = vmatpush3.bf16.msra.mxu1 %v1699_v44 }
  0x6c   :  { %1530 = vmatprep.subr.bf16.mxu1 %v1703_v57  ;;  %v1730_v57 = vld [vmem:[#allocation6 + $0x1e0] ss:$12 sps:$4 sm:$0xff]  }
  0x6e   :  { %928 = vmatpush1.bf16.msra.mxu0 %v1664_v37  ;;  %v1710_v37 = vld [vmem:[#allocation6 + $0x180] ss:$12 sps:$4 sm:$0xff]  }
  0x6f   :  { %929 = vmatprep.subr.bf16.mxu0 %v1669_v40  ;;  %1531 = vmatpush3.bf16.msra.mxu1 %v1704_v59  ;;  %v1717_v40 = vld [vmem:[#allocation6 + $0x19c] ss:$12 sps:$4 sm:$0xff]  }
  0x70   :  { %1532 = vmatprep.subr.bf16.mxu1 %v1708_v61  ;;  %v1737_v59 = vld [vmem:[#allocation6 + $0x1fc] ss:$12 sps:$4 sm:$0xff]   ;;  %v1735_v61 = vld [vmem:[#allocation6 + $0x1f8] ss:$12 sps:$4 sm:$0xff]  }
  0x72   :  { %930 = vmatpush1.bf16.msra.mxu0 %v1667_v41  ;;  %v1718_v41 = vld [vmem:[#allocation6 + $0x260] ss:$12 sps:$4 sm:$0xff]  }
  0x73   :  { %931 = vmatprep.subr.bf16.mxu0 %v1672_v43  ;;  %1533 = vmatpush3.bf16.msra.mxu1 %v1709_v63  ;;  %v1742_v63 = vld [vmem:[#allocation6 + $0x214] ss:$12 sps:$4 sm:$0xff]  }
  0x74   :  { %1540 = vmatprep.subr.bf16.mxu1 %v1713_v1  ;;  %v1740_v1 = vld [vmem:[#allocation6 + $0x210] ss:$12 sps:$4 sm:$0xff]  }
  0x76   :  { %932 = vmatpush1.bf16.msra.mxu0 %v1670_v45  ;;  %v1715_v45 = vld [vmem:[#allocation6 + $0x198] ss:$12 sps:$4 sm:$0xff]  }
  0x77   :  { %933 = vmatprep.subr.bf16.mxu0 %v1677_v46  ;;  %v1719_v46 = vld [vmem:[#allocation6 + $0x1a0] ss:$12 sps:$4 sm:$0xff]  }
  0x7a   :  { %934 = vmatpush1.bf16.msra.mxu0 %v1675_v47  ;;  %v1722_v47 = vld [vmem:[#allocation6 + $0x1b4] ss:$12 sps:$4 sm:$0xff]  }
  0x7b   :  { %935 = vmatprep.subr.bf16.mxu0 %v1682_v48  ;;  %v1723_v48 = vld [vmem:[#allocation6 + $0x278] ss:$12 sps:$4 sm:$0xff]  }
  0x7e   :  { %936 = vmatpush1.bf16.msra.mxu0 %v1680_v49  ;;  %v1720_v49 = vld [vmem:[#allocation6 + $0x1b0] ss:$12 sps:$4 sm:$0xff]  }
  0x7f   :  { %937 = vmatprep.subr.bf16.mxu0 %v1687_v50  ;;  %v1724_v50 = vld [vmem:[#allocation6 + $0x1b8] ss:$12 sps:$4 sm:$0xff]  }
  0x82   :  { %938 = vmatpush1.bf16.msra.mxu0 %v1685_v51  ;;  %v1727_v51 = vld [vmem:[#allocation6 + $0x1cc] ss:$12 sps:$4 sm:$0xff]  }
  0x83   :  { %939 = vmatprep.subr.bf16.mxu0 %v1692_v52  ;;  %v1728_v52 = vld [vmem:[#allocation6 + $0x290] ss:$12 sps:$4 sm:$0xff]  }
  0x86   :  { %940 = vmatpush1.bf16.msra.mxu0 %v1690_v53  ;;  %v1725_v53 = vld [vmem:[#allocation6 + $0x1c8] ss:$12 sps:$4 sm:$0xff]  }
  0x87   :  { %941 = vmatprep.subr.bf16.mxu0 %v1697_v54  ;;  %v1729_v54 = vld [vmem:[#allocation6 + $0x1d0] ss:$12 sps:$4 sm:$0xff]  }
  0x8a   :  { %942 = vmatpush1.bf16.msra.mxu0 %v1695_v55  ;;  %v1732_v55 = vld [vmem:[#allocation6 + $0x1e4] ss:$12 sps:$4 sm:$0xff]  }
  0x8b   :  { %943 = vmatprep.subr.bf16.mxu0 %v1702_v56  ;;  %v1733_v56 = vld [vmem:[#allocation6 + $0x2a8] ss:$12 sps:$4 sm:$0xff]  }
  0x8e   :  { %944 = vmatpush1.bf16.msra.mxu0 %v1700_v58  ;;  %v1734_v58 = vld [vmem:[#allocation6 + $0x1e8] ss:$12 sps:$4 sm:$0xff]  }
  0x8f   :  { %945 = vmatprep.subr.bf16.mxu0 %v1707_v60  ;;  %v1738_v60 = vld [vmem:[#allocation6 + $0x2c0] ss:$12 sps:$4 sm:$0xff]  }
  0x92   :  { %946 = vmatpush1.bf16.msra.mxu0 %v1705_v62  ;;  %v1739_v62 = vld [vmem:[#allocation6 + $0x200] ss:$12 sps:$4 sm:$0xff]  }
  0x93   :  { %958 = vmatprep.subr.bf16.mxu0 %v1712_v0  ;;  %v1743_v0 = vld [vmem:[#allocation6 + $0x2d8] ss:$12 sps:$4 sm:$0xff]  }
 0x128   :  { %v194_v11 = vpop.f32.mrb[0].mxu0 }
 0x129   :  { %v195_v13 = vadd.f32 %v194_v11, %v96_v8  ;;  %v196_v14 = vpop.f32.mrb[1].mxu0  ;;  %v237_v20 = vpop.f32.mrb[0].mxu1  ;;  %v1752_v11 = vld [vmem:[#allocation6 + $0x244] ss:$12 sps:$4 sm:$0xff]  }
 0x12a   :  { %v197_v16 = vadd.f32 %v196_v14, %v100_v10  ;;  %v198_v17 = vpop.f32.mrb[2].mxu0  ;;  %v238_v22 = vadd.f32 %v237_v20, %v104_v12  ;;  %v239_v23 = vpop.f32.mrb[1].mxu1  ;;  %v1753_v14 = vld [vmem:[#allocation6 + $0x258] ss:$12 sps:$4 sm:$0xff]   ;;  %v1762_v20 = vld [vmem:[#allocation6 + $0x2a0] ss:$12 sps:$4 sm:$0xff]  }
 0x12b   :  { %v199_v18 = vadd.f32 %v198_v17, %v96_v8  ;;  %v200_v19 = vpop.f32.mrb[3].mxu0  ;;  %v246_v24 = vmax.f32 %v195_v13, 0.0  ;;  %v240_v26 = vadd.f32 %v239_v23, %v108_v15  ;;  %v241_v27 = vpop.f32.mrb[2].mxu1  ;;  %v1748_v8 = vld [vmem:[#allocation6 + $0x2f0] ss:$12 sps:$4 sm:$0xff]  }
 0x12c   :  { %v201_v21 = vadd.f32 %v200_v19, %v100_v10  ;;  %v247_v28 = vmax.f32 %v197_v16, 0.0  ;;  %v248_v30 = vmax.f32 %v238_v22, 0.0  ;;  %v242_v31 = vadd.f32 %v241_v27, %v104_v12  ;;  %v243_v32 = vpop.f32.mrb[3].mxu1  ;;  %v1749_v10 = vld [vmem:[#allocation6 + $0x230] ss:$12 sps:$4 sm:$0xff]   ;;  %v1774_v27 = vld [vmem:[#allocation7 + $0x40] sm:$0xff]  }
 0x12d   :  { %v250_v25 = vmax.f32 %v199_v18, 0.0  ;;  %v249_v34 = vmax.f32 %v240_v26, 0.0  ;;  %v244_v35 = vadd.f32 %v243_v32, %v108_v15  ;;  %v1750_v12 = vld [vmem:[#allocation6 + $0x240] ss:$12 sps:$4 sm:$0xff]   ;;  %v1755_v13 = vld [vmem:[#allocation6 + $0x25c] ss:$12 sps:$4 sm:$0xff]  }
 0x12e   :  { %v251_v29 = vmax.f32 %v201_v21, 0.0  ;;  %v252_v39 = vmax.f32 %v242_v31, 0.0  ;;  %v1758_v15 = vld [vmem:[#allocation6 + $0x274] ss:$12 sps:$4 sm:$0xff]   ;;  %v1756_v16 = vld [vmem:[#allocation6 + $0x270] ss:$12 sps:$4 sm:$0xff]  }
 0x12f   :  { %v254_v33 = vpack.c.bf16 %v250_v25, %v246_v24  ;;  %v253_v42 = vmax.f32 %v244_v35, 0.0  ;;  %v1761_v17 = vld [vmem:[#allocation6 + $0x28c] ss:$12 sps:$4 sm:$0xff]   ;;  %v1759_v18 = vld [vmem:[#allocation6 + $0x288] ss:$12 sps:$4 sm:$0xff]   ;;  %v1782_v35 = vld [vmem:[#allocation7 + $0x60] sm:$0xff]  }
 0x130   :  { %v255_v36 = vpack.c.bf16 %v251_v29, %v247_v28  ;;  %v2018_v43 = vpack.c.bf16 %v252_v39, %v248_v30  ;;  %v1764_v19 = vld [vmem:[#allocation6 + $0x2a4] ss:$12 sps:$4 sm:$0xff]   ;;  %v1767_v21 = vld [vmem:[#allocation6 + $0x2bc] ss:$12 sps:$4 sm:$0xff]   ;;  %v1770_v23 = vld [vmem:[#allocation6 + $0x2d4] ss:$12 sps:$4 sm:$0xff]  }
 0x131   :  { %v257_v44 = vpack.c.bf16 %v253_v42, %v249_v34  ;;  %v1765_v22 = vld [vmem:[#allocation6 + $0x2b8] ss:$12 sps:$4 sm:$0xff]   ;;  %v1768_v24 = vld [vmem:[#allocation6 + $0x2d0] ss:$12 sps:$4 sm:$0xff]   ;;  %v1771_v26 = vld [vmem:[#allocation6 + $0x2e8] ss:$12 sps:$4 sm:$0xff]  }
 0x132   :  { %947 = vmatprep.mubr.bf16.mxu0 %v255_v36  ;;  %1033 = vmatprep.mubr.bf16.mxu1 %v255_v36  ;;  %v1773_v25 = vld [vmem:[#allocation6 + $0x2ec] ss:$12 sps:$4 sm:$0xff]   ;;  %v1775_v28 = vld [vmem:[#allocation7] sm:$0xff]   ;;  %v1778_v31 = vld [vmem:[#allocation7 + $0x50] sm:$0xff]  }
 0x133   :  { %948 = vmatmul.mubr.bf16.vlgmr.msra.gmra.mrb[4].mxu0 %v254_v33  ;;  %1034 = vmatmul.mubr.bf16.vlgmr.msra.gmra.mrb[4].mxu1 %v254_v33  ;;  %v1776_v29 = vld [vmem:[#allocation7 + $0x48] sm:$0xff]   ;;  %v1779_v32 = vld [vmem:[#allocation7 + $0x10] sm:$0xff]   ;;  %v1780_v33 = vld [vmem:[#allocation7 + $0x58] sm:$0xff]  }
 0x134   :  { %959 = vmatpush1.bf16.msra.mxu0 %v1710_v37  ;;  %1541 = vmatpush3.bf16.msra.mxu1 %v1714_v38  ;;  %v1777_v30 = vld [vmem:[#allocation7 + $0x8] sm:$0xff]   ;;  %v1781_v34 = vld [vmem:[#allocation7 + $0x18] sm:$0xff]   ;;  %v1783_v36 = vld [vmem:[#allocation7 + $0x20] sm:$0xff]  }
 0x135   :  { %960 = vmatprep.subr.bf16.mxu0 %v1717_v40  ;;  %1542 = vmatprep.subr.bf16.mxu1 %v1718_v41  ;;  %v1784_v37 = vld [vmem:[#allocation7 + $0x68] sm:$0xff]   ;;  %v1786_v39 = vld [vmem:[#allocation7 + $0x70] sm:$0xff]   ;;  %v1788_v41 = vld [vmem:[#allocation7 + $0x78] sm:$0xff]  }
 0x136   :  { %1074 = vmatprep.mubr.bf16.mxu1 %v257_v44  ;;  %990 = vmatprep.mubr.bf16.mxu0 %v257_v44  ;;  %v1785_v38 = vld [vmem:[#allocation7 + $0x28] sm:$0xff]   ;;  %v1787_v40 = vld [vmem:[#allocation7 + $0x30] sm:$0xff]   ;;  %v1789_v42 = vld [vmem:[#allocation7 + $0x38] sm:$0xff]  }
 0x138   :  { %961 = vmatpush1.bf16.msra.mxu0 %v1715_v45  ;;  %1543 = vmatpush3.bf16.msra.mxu1 %v1719_v46 }
 0x139   :  { %962 = vmatprep.subr.bf16.mxu0 %v1722_v47  ;;  %1544 = vmatprep.subr.bf16.mxu1 %v1723_v48 }
 0x13c   :  { %963 = vmatpush1.bf16.msra.mxu0 %v1720_v49  ;;  %1545 = vmatpush3.bf16.msra.mxu1 %v1724_v50  ;;  %v386_v50 = vld [vmem:[%s2053_s4] sm:$0x7] }
 0x13d   :  { %964 = vmatprep.subr.bf16.mxu0 %v1727_v51  ;;  %1546 = vmatprep.subr.bf16.mxu1 %v1728_v52  ;;  %v399_v51 = vrot.slane %v386_v50, %v103_v7 }
 0x140   :  { %965 = vmatpush1.bf16.msra.mxu0 %v1725_v53  ;;  %1547 = vmatpush3.bf16.msra.mxu1 %v1729_v54 }
 0x141   :  { %966 = vmatprep.subr.bf16.mxu0 %v1732_v55  ;;  %1548 = vmatprep.subr.bf16.mxu1 %v1733_v56 }
 0x144   :  { %967 = vmatpush1.bf16.msra.mxu0 %v1730_v57  ;;  %1549 = vmatpush3.bf16.msra.mxu1 %v1734_v58 }
 0x145   :  { %968 = vmatprep.subr.bf16.mxu0 %v1737_v59  ;;  %1550 = vmatprep.subr.bf16.mxu1 %v1738_v60 }
 0x148   :  { %969 = vmatpush1.bf16.msra.mxu0 %v1735_v61  ;;  %1551 = vmatpush3.bf16.msra.mxu1 %v1739_v62 }
 0x149   :  { %970 = vmatprep.subr.bf16.mxu0 %v1742_v63  ;;  %1552 = vmatprep.subr.bf16.mxu1 %v1743_v0 }
 0x14c   :  { %971 = vmatpush1.bf16.msra.mxu0 %v1740_v1  ;;  %1553 = vmatpush3.bf16.msra.mxu1 %v1744_v2  ;;  %v391_v1 = vrot.slane %v386_v50, %v95_v4  ;;  %v395_v2 = vrot.slane %v386_v50, %v99_v6  ;;  %v1792_v4 = vld [vmem:[#allocation7 + $0x90] sm:$0xff]   ;;  %v1793_v6 = vld [vmem:[#allocation7 + $0x98] sm:$0xff]  }
 0x14d   :  { %972 = vmatprep.subr.bf16.mxu0 %v1747_v5  ;;  %1554 = vmatprep.subr.bf16.mxu1 %v1748_v8 }
 0x150   :  { %973 = vmatpush1.bf16.msra.mxu0 %v1745_v9  ;;  %1555 = vmatpush3.bf16.msra.mxu1 %v1749_v10 }
 0x151   :  { %974 = vmatprep.subr.bf16.mxu0 %v1752_v11  ;;  %1562 = vmatprep.subr.bf16.mxu1 %v1774_v27 }
 0x153   :  { %1075 = vmatmul.mubr.bf16.vlgmr.msra.gmra.mrb[8].mxu1 %v2018_v43 }
 0x154   :  { %975 = vmatpush1.bf16.msra.mxu0 %v1750_v12  ;;  %1563 = vmatpush3.bf16.msra.mxu1 %v1775_v28 }
 0x155   :  { %976 = vmatprep.subr.bf16.mxu0 %v1755_v13  ;;  %1564 = vmatprep.subr.bf16.mxu1 %v1776_v29 }
 0x158   :  { %977 = vmatpush1.bf16.msra.mxu0 %v1753_v14  ;;  %1565 = vmatpush3.bf16.msra.mxu1 %v1777_v30 }
 0x159   :  { %978 = vmatprep.subr.bf16.mxu0 %v1758_v15  ;;  %1566 = vmatprep.subr.bf16.mxu1 %v1778_v31  ;;  %v1493_v31 = vld [vmem:[%s2055_s6] ss:$0 sm:$0xff] }
 0x15c   :  { %979 = vmatpush1.bf16.msra.mxu0 %v1756_v16  ;;  %1567 = vmatpush3.bf16.msra.mxu1 %v1779_v32 }
 0x15d   :  { %980 = vmatprep.subr.bf16.mxu0 %v1761_v17  ;;  %1568 = vmatprep.subr.bf16.mxu1 %v1780_v33 }
 0x160   :  { %981 = vmatpush1.bf16.msra.mxu0 %v1759_v18  ;;  %1569 = vmatpush3.bf16.msra.mxu1 %v1781_v34 }
 0x161   :  { %982 = vmatprep.subr.bf16.mxu0 %v1764_v19  ;;  %1570 = vmatprep.subr.bf16.mxu1 %v1782_v35 }
 0x164   :  { %983 = vmatpush1.bf16.msra.mxu0 %v1762_v20  ;;  %1571 = vmatpush3.bf16.msra.mxu1 %v1783_v36  ;;  %v1790_v20 = vld [vmem:[#allocation7 + $0x80] sm:$0xff]  }
 0x165   :  { %984 = vmatprep.subr.bf16.mxu0 %v1767_v21  ;;  %1572 = vmatprep.subr.bf16.mxu1 %v1784_v37  ;;  %v1794_v21 = vld [vmem:[#allocation7 + $0xa0] sm:$0xff]  }
 0x168   :  { %985 = vmatpush1.bf16.msra.mxu0 %v1765_v22  ;;  %1573 = vmatpush3.bf16.msra.mxu1 %v1785_v38  ;;  %v1795_v22 = vld [vmem:[#allocation7 + $0xa8] sm:$0xff]  }
 0x169   :  { %986 = vmatprep.subr.bf16.mxu0 %v1770_v23  ;;  %1574 = vmatprep.subr.bf16.mxu1 %v1786_v39  ;;  %v1796_v23 = vld [vmem:[#allocation7 + $0xb0] sm:$0xff]  }
 0x16c   :  { %987 = vmatpush1.bf16.msra.mxu0 %v1768_v24  ;;  %1575 = vmatpush3.bf16.msra.mxu1 %v1787_v40  ;;  %v1797_v24 = vld [vmem:[#allocation7 + $0xb8] sm:$0xff]  }
 0x16d   :  { %988 = vmatprep.subr.bf16.mxu0 %v1773_v25  ;;  %1576 = vmatprep.subr.bf16.mxu1 %v1788_v41 }
 0x170   :  { %989 = vmatpush1.bf16.msra.mxu0 %v1771_v26  ;;  %1577 = vmatpush3.bf16.msra.mxu1 %v1789_v42 }
 0x173   :  { %991 = vmatmul.mubr.bf16.vlgmr.msra.gmra.mrb[4].mxu0 %v2018_v43  ;;  %v1909_v43 = vmov 0.0  }
 0x174   :  { %1593 = vmatprep.subr.bf16.mxu1 %v1909_v43 }
 0x206   :  { %v1534_v44 = vpop.f32.mrb[4].mxu1 }
 0x207   :  { %v1535_v45 = vpop.f32.mrb[5].mxu1 }
 0x208   :  { %v1536_v46 = vadd.f32 %v1535_v45, %v1534_v44  ;;  %v1537_v47 = vpop.f32.mrb[6].mxu1 }
 0x209   :  { %v1538_v48 = vpop.f32.mrb[7].mxu1 }
 0x20a   :  { %v1539_v49 = vadd.f32 %v1538_v48, %v1537_v47  ;;  %v1036_v54 = vadd.f32 %v1536_v46, %v399_v51 }
 0x20c   :  { %v1039_v58 = vadd.f32 %v1539_v49, %v399_v51 }
 0x226   :  { %v1556_v52 = vpop.f32.mrb[8].mxu1 }
 0x227   :  { %v1557_v53 = vpop.f32.mrb[9].mxu1 }
 0x228   :  { %v1558_v55 = vadd.f32 %v1557_v53, %v1556_v52  ;;  %v1559_v56 = vpop.f32.mrb[10].mxu1 }
 0x229   :  { %v1560_v57 = vpop.f32.mrb[11].mxu1 }
 0x22a   :  { %v1077_v59 = vadd.f32 %v1558_v55, %v1036_v54  ;;  %v1561_v60 = vadd.f32 %v1560_v57, %v1559_v56 }
 0x22c   :  { %v1080_v61 = vadd.f32 %v1561_v60, %v1039_v58  ;;  %v1085_v62 = vmax.f32 %v1077_v59, 0.0 }
 0x22e   :  { %v1088_v63 = vmax.f32 %v1080_v61, 0.0 }
 0x230   :  { %v1091_v0 = vpack.c.bf16 %v1088_v63, %v1085_v62 }
 0x246   :  { %v992_v7 = vpop.f32.mrb[4].mxu0 }
 0x247   :  { %v1613_v5 = vadd.f32 %v992_v7, %v391_v1  ;;  %v994_v8 = vpop.f32.mrb[5].mxu0 }
 0x248   :  { %v1614_v9 = vadd.f32 %v994_v8, %v395_v2  ;;  %v996_v10 = vpop.f32.mrb[6].mxu0 }
 0x249   :  { %v1615_v11 = vadd.f32 %v996_v10, %v391_v1  ;;  %v998_v12 = vpop.f32.mrb[7].mxu0  ;;  %v1083_v14 = vmax.f32 %v1613_v5, 0.0 }
 0x24a   :  { %v1616_v13 = vadd.f32 %v998_v12, %v395_v2  ;;  %v1084_v16 = vmax.f32 %v1614_v9, 0.0 }
 0x24b   :  { %v1086_v15 = vmax.f32 %v1615_v11, 0.0 }
 0x24c   :  { %v1087_v17 = vmax.f32 %v1616_v13, 0.0 }
 0x24d   :  { %v1089_v18 = vpack.c.bf16 %v1086_v15, %v1083_v14 }
 0x24e   :  { %v1090_v19 = vpack.c.bf16 %v1087_v17, %v1084_v16 }
 0x250   :  { %1323 = vmatprep.mubr.bf16.mxu1 %v1090_v19 }
 0x251   :  { %1324 = vmatmul.mubr.bf16.vlgmr.msra.gmra.mrb[12].mxu1 %v1089_v18 }
 0x252   :  { %1594 = vmatpush3.bf16.msra.mxu1 %v1790_v20  ;;  %1609 = vmatprep.mubr.msk.bf16.mxu1 %vm1910_vm2, %v1909_v43 }
 0x253   :  { %1595 = vmatprep.subr.bf16.mxu1 %v1909_v43 }
 0x256   :  { %1596 = vmatpush3.bf16.msra.mxu1 %v1791_v3 }
 0x257   :  { %1597 = vmatprep.subr.bf16.mxu1 %v1909_v43 }
 0x25a   :  { %1598 = vmatpush3.bf16.msra.mxu1 %v1792_v4 }
 0x25b   :  { %1599 = vmatprep.subr.bf16.mxu1 %v1909_v43 }
 0x25e   :  { %1600 = vmatpush3.bf16.msra.mxu1 %v1793_v6 }
 0x25f   :  { %1601 = vmatprep.subr.bf16.mxu1 %v1909_v43 }
 0x262   :  { %1602 = vmatpush3.bf16.msra.mxu1 %v1794_v21 }
 0x263   :  { %1603 = vmatprep.subr.bf16.mxu1 %v1909_v43 }
 0x266   :  { %1604 = vmatpush3.bf16.msra.mxu1 %v1795_v22 }
 0x267   :  { %1605 = vmatprep.subr.bf16.mxu1 %v1909_v43 }
 0x26a   :  { %1606 = vmatpush3.bf16.msra.mxu1 %v1796_v23 }
 0x26b   :  { %1607 = vmatprep.subr.bf16.mxu1 %v1909_v43 }
 0x26e   :  { %1608 = vmatpush3.bf16.msra.mxu1 %v1797_v24 }
 0x271   :  { %1610 = vmatmul.mubr.bf16.vlgmr.msra.gmra.mrb[16].mxu1 %v1091_v0 }
 0x324   :  { %v1578_v25 = vpop.f32.mrb[12].mxu1 }
 0x325   :  { %v1579_v26 = vpop.f32.mrb[13].mxu1 }
 0x326   :  { %v1580_v27 = vadd.f32 %v1579_v26, %v1578_v25  ;;  %v1581_v28 = vpop.f32.mrb[14].mxu1 }
 0x327   :  { %v1582_v29 = vpop.f32.mrb[15].mxu1 }
 0x328   :  { %v1583_v30 = vadd.f32 %v1582_v29, %v1581_v28  ;;  %v1326_v32 = vadd.f32 %v1580_v27, %v1493_v31 }
 0x32a   :  { %v1329_v36 = vadd.f32 %v1583_v30, %v1493_v31 }
 0x344   :  { %v1366_v33 = vpop.f32.mrb[16].mxu1 }
 0x345   :  { %v1367_v34 = vadd.f32 %v1366_v33, %v1326_v32  ;;  %v1611_v35 = vpop.f32.mrb[17].mxu1 }
 0x346   :  { %v1369_v37 = vpop.f32.mrb[18].mxu1 }
 0x347   :  { %1798 = vtanh.f32 %v1367_v34  ;;  %v1370_v38 = vadd.f32 %v1369_v37, %v1329_v36  ;;  %v1612_v39 = vpop.f32.mrb[19].mxu1 }
 0x349   :  { %1800 = vtanh.f32 %v1370_v38 }
 0x351   :  { %v1799_v40 = vpop.eup %1798 }
 0x352   :  { %1376 = vst.msk [vmem:[%s2056_s7] sm:$0xff] %vm1375_vm3, %v1799_v40 }
 0x353   :  { %v1801_v41 = vpop.eup %1800 }
 0x354   :  { %1377 = vst.msk [vmem:[%s2056_s7 + $0x8] sm:$0xff] %vm1375_vm3, %v1801_v41 }
 0x355   :  { %1382 = vsyncpa [#allocation3], 1 }
 0x356   :  { %1383 = vsyncpa [#allocation5], 1 }
 0x357   :  { %1384 = vsyncpa [#allocation8], 1 }

</bundles_post_ra>
